<compile_context>
chip_gen: v7x
topology: tpu7x:2x2x1
jax: 0.10.0
libtpu: 0.0.40
codegen_flags: <defaults>
</compile_context>

<pallas_src>
import functools

import jax
import jax.numpy as jnp
from jax.experimental import pallas as pl
from jax.experimental.pallas import tpu as pltpu


def _round_up(x, m):
    return -(-x // m) * m


def _conv3x3_kernel(x_ref, w_ref, b_ref, o_ref, xp_ref, pat_ref, *,
                    width, margin):
    """3x3 / stride 1 / pad 1 conv for one image, spatial dims flattened.

    x_ref   : (Cin, H*W)            input image, spatial on the lane axis
    w_ref   : (Cout, 9*Cin_pad)     per-tap channel-padded weights
    b_ref   : (Cout, 1)             bias
    o_ref   : (Cout, H*W)           output, spatial on the lane axis
    xp_ref  : (Cin_pad, H*W + 2*M)  zero-haloed copy of the input (scratch)
    pat_ref : (9*Cin_pad, H*W)      im2col patch matrix (scratch)
    """
    Cin, HW = x_ref.shape
    W = width
    M = margin
    Cin_pad = xp_ref.shape[0]

    # Padding folded into the kernel: zero the haloed scratch, drop the image
    # in the middle.  The left/right margins (>= W+1 lanes) supply zeros for
    # the dy=-1 / dy=+1 taps of the first / last image rows, and rows
    # [Cin, Cin_pad) pad the channels to a full sublane tile so every patch
    # store below is sublane-aligned.
    xp_ref[...] = jnp.zeros_like(xp_ref)
    xp_ref[:Cin, M:M + HW] = x_ref[...]

    # Column index of each flattened spatial position: dx=+-1 taps must not
    # wrap across row boundaries.
    col = jax.lax.broadcasted_iota(jnp.int32, (1, HW), 1) % W
    not_first_col = col != 0
    not_last_col = col != (W - 1)

    # Build the im2col patch matrix: tap (ky, kx) is a shifted lane window of
    # the haloed input (shift = (ky-1)*W + (kx-1)).
    for ky in range(3):
        for kx in range(3):
            k = ky * 3 + kx
            s = (ky - 1) * W + (kx - 1)
            tap = xp_ref[:, M + s:M + s + HW]
            if kx == 0:
                tap = jnp.where(not_first_col, tap, 0.0)
            elif kx == 2:
                tap = jnp.where(not_last_col, tap, 0.0)
            pat_ref[k * Cin_pad:(k + 1) * Cin_pad, :] = tap

    # One MXU matmul over the folded contraction (K = 9*Cin_pad) + fused bias.
    acc = jnp.dot(w_ref[...], pat_ref[...],
                  preferred_element_type=jnp.float32)
    o_ref[...] = (acc + b_ref[...]).astype(o_ref.dtype)


def fpn_conv3x3(x_nchw, w_hwio, bias):
    """3x3 conv, stride 1, padding 1. x: (N, Cin, H, W) -> (N, Cout, H, W)."""
    N, Cin, H, W = x_nchw.shape
    Cout = w_hwio.shape[-1]
    HW = H * W
    Cin_pad = _round_up(Cin, 8)
    Kp = 9 * Cin_pad
    margin = _round_up(W + 1, 128)          # lane-aligned halo, >= W+1

    # Flatten spatial onto the lane axis (contiguous reshape: metadata only).
    x_flat = x_nchw.reshape(N, Cin, HW)

    # (3,3,Cin,Cout) -> (Cout, 9*Cin_pad): tap-major K, each tap's channel
    # block zero-padded to Cin_pad so its rows of the patch matrix are
    # sublane-aligned.  Tiny one-off transform on the weights only.
    w_k = jnp.transpose(w_hwio.reshape(9 * Cin, Cout)).reshape(Cout, 9, Cin)
    w_pad = jnp.zeros((Cout, 9, Cin_pad), w_k.dtype).at[:, :, :Cin].set(w_k)
    w_pad = w_pad.reshape(Cout, Kp)
    b2 = bias.reshape(Cout, 1)
    # NOTE: on v6e/v7x, casting x_flat / w_pad to bf16 here (keeping the f32
    # MXU accumulation) would halve HBM/VMEM traffic; kept f32 so the result
    # matches the f32 lax reference tightly.

    kernel = functools.partial(_conv3x3_kernel, width=W, margin=margin)

    out_flat = pl.pallas_call(
        kernel,
        out_shape=jax.ShapeDtypeStruct((N, Cout, HW), x_nchw.dtype),
        grid=(N,),
        in_specs=[
            pl.BlockSpec((pl.Squeezed(), Cin, HW), lambda n: (n, 0, 0)),
            pl.BlockSpec((Cout, Kp), lambda n: (0, 0)),
            pl.BlockSpec((Cout, 1), lambda n: (0, 0)),
        ],
        out_specs=pl.BlockSpec((pl.Squeezed(), Cout, HW),
                               lambda n: (n, 0, 0)),
        scratch_shapes=[
            pltpu.VMEM((Cin_pad, HW + 2 * margin), x_nchw.dtype),
            pltpu.VMEM((Kp, HW), x_nchw.dtype),
        ],
        compiler_params=pltpu.CompilerParams(
            dimension_semantics=("parallel",)),
    )(x_flat, w_pad, b2)

    return out_flat.reshape(N, Cout, H, W)


def init_fpn_params(key, backbone_output_channels, output_channels=256):
    """Deterministic synthetic init matching normal_init(m, 0, 0.01) + zero bias.

    Weights are stored in HWIO layout (3, 3, Cin, Cout)."""
    params = {}
    for i, name in enumerate(("p2", "p3", "p4", "p5")):
        k = jax.random.fold_in(key, i)
        w = 0.01 * jax.random.normal(
            k, (3, 3, backbone_output_channels, output_channels), jnp.float32)
        b = jnp.zeros((output_channels,), jnp.float32)
        params[name] = (w, b)
    return params


def feature_pyramid_network_forward(params, X):
    """X = (p2, p3, p4, p5) feature maps, each NCHW. Returns (p2..p6) NCHW."""
    x2, x3, x4, x5 = X
    p2 = fpn_conv3x3(x2, *params["p2"])
    p3 = fpn_conv3x3(x3, *params["p3"])
    p4 = fpn_conv3x3(x4, *params["p4"])
    p5 = fpn_conv3x3(x5, *params["p5"])
    # MaxPool2d(kernel_size=1, stride=2) is a pure strided subsample (no
    # reduction window) -> kept as a single cheap XLA strided slice.
    p6 = p5[:, :, ::2, ::2]
    return (p2, p3, p4, p5, p6)


def _reference_conv3x3(x_nchw, w_hwio, bias):
    """Pure-JAX reference (lax conv) for correctness check."""
    w_oihw = jnp.transpose(w_hwio, (3, 2, 0, 1))
    y = jax.lax.conv_general_dilated(
        x_nchw, w_oihw, window_strides=(1, 1), padding=((1, 1), (1, 1)),
        dimension_numbers=("NCHW", "OIHW", "NCHW"))
    return y + bias[None, :, None, None]


if __name__ == "__main__":
    key = jax.random.PRNGKey(0)

    backbone_output_channels = 4
    output_channels = 32
    N = 2

    params = init_fpn_params(key, backbone_output_channels, output_channels)

    # Pyramid of backbone feature maps (NCHW), progressively halved spatially.
    kx = jax.random.fold_in(key, 100)
    x2 = jax.random.normal(jax.random.fold_in(kx, 2),
                           (N, backbone_output_channels, 16, 16), jnp.float32)
    x3 = jax.random.normal(jax.random.fold_in(kx, 3),
                           (N, backbone_output_channels, 8, 8), jnp.float32)
    x4 = jax.random.normal(jax.random.fold_in(kx, 4),
                           (N, backbone_output_channels, 4, 4), jnp.float32)
    x5 = jax.random.normal(jax.random.fold_in(kx, 5),
                           (N, backbone_output_channels, 4, 4), jnp.float32)

    outs = feature_pyramid_network_forward(params, (x2, x3, x4, x5))
    outs = jax.block_until_ready(outs)
    p2, p3, p4, p5, p6 = outs

    # Sanity-check the Pallas conv against the lax reference.
    got_by_name = {"p2": p2, "p3": p3, "p4": p4, "p5": p5}
    for name, x in zip(("p2", "p3", "p4", "p5"), (x2, x3, x4, x5)):
        w, b = params[name]
        ref = _reference_conv3x3(x, w, b)
        got = got_by_name[name]
        assert got.shape == ref.shape
        assert jnp.max(jnp.abs(got - ref)) < 2e-4, f"{name} mismatch"
    ref_p6 = _reference_conv3x3(x5, *params["p5"])[:, :, ::2, ::2]
    assert p6.shape == ref_p6.shape
    assert jnp.max(jnp.abs(p6 - ref_p6)) < 2e-4

    print("KERNEL_OK")
</pallas_src>

<mosaic_0001>
module attributes {stable_mosaic.version = 11 : i64} {
  func.func @_conv3x3_kernel(%arg0: i32, %arg1: memref<1x4x256xf32, #tpu.memory_space<vmem>>, %arg2: memref<32x72xf32, #tpu.memory_space<vmem>>, %arg3: memref<32x1xf32, #tpu.memory_space<vmem>>, %arg4: memref<1x32x256xf32, #tpu.memory_space<vmem>>, %arg5: memref<8x512xf32, #tpu.memory_space<vmem>>, %arg6: memref<72x256xf32, #tpu.memory_space<vmem>>) attributes {dimension_semantics = [#tpu.dimension_semantics<parallel>], iteration_bounds = array<i64: 2>, scalar_prefetch = 0 : i64, scratch_operands = 2 : i64, tpu.core_type = #tpu.core_type<tc>, window_params = [{transform_indices = @transform_0, window_bounds = array<i64: 1, 4, 256>}, {pipeline_mode = #tpu.pipeline_mode<synchronous>, transform_indices = @transform_1, window_bounds = array<i64: 32, 72>}, {pipeline_mode = #tpu.pipeline_mode<synchronous>, transform_indices = @transform_2, window_bounds = array<i64: 32, 1>}, {transform_indices = @transform_3, window_bounds = array<i64: 1, 32, 256>}]} {
    %cst = arith.constant 0.000000e+00 : f32
    %0 = vector.broadcast %cst : f32 to vector<8x512xf32>
    %c0 = arith.constant 0 : index
    %c0_0 = arith.constant 0 : index
    %1 = vector.load %arg5[%c0, %c0_0] : memref<8x512xf32, #tpu.memory_space<vmem>>, vector<8x512xf32>
    tpu.vector_store %arg5[%c0, %c0_0], %0 {strides = array<i32>} : memref<8x512xf32, #tpu.memory_space<vmem>>, vector<8x512xf32>,
    %c0_1 = arith.constant 0 : index
    %c0_2 = arith.constant 0 : index
    %c0_3 = arith.constant 0 : index
    %2 = vector.load %arg1[%c0_1, %c0_2, %c0_3] : memref<1x4x256xf32, #tpu.memory_space<vmem>>, vector<1x4x256xf32>
    %3 = vector.shape_cast %2 : vector<1x4x256xf32> to vector<4x256xf32>
    %c0_4 = arith.constant 0 : index
    %c128 = arith.constant 128 : index
    %4 = vector.load %arg5[%c0_4, %c128] : memref<8x512xf32, #tpu.memory_space<vmem>>, vector<4x256xf32>
    tpu.vector_store %arg5[%c0_4, %c128], %3 {strides = array<i32>} : memref<8x512xf32, #tpu.memory_space<vmem>>, vector<4x256xf32>,
    %5 = tpu.iota {dimensions = array<i32: 1>} : vector<1x256xi32>
    %c16_i32 = arith.constant 16 : i32
    %c0_i32 = arith.constant 0 : i32
    %6 = arith.cmpi eq, %c16_i32, %c0_i32 : i32
    %c1_i32 = arith.constant 1 : i32
    %7 = arith.select %6, %c1_i32, %c16_i32 : i32
    %8 = vector.broadcast %7 : i32 to vector<1x256xi32>
    %9 = arith.remsi %5, %8 : vector<1x256xi32>
    %c0_i32_5 = arith.constant 0 : i32
    %10 = vector.broadcast %c0_i32_5 : i32 to vector<1x256xi32>
    %11 = arith.cmpi ne, %9, %10 : vector<1x256xi32>
    %c0_i32_6 = arith.constant 0 : i32
    %12 = vector.broadcast %c0_i32_6 : i32 to vector<1x256xi32>
    %13 = arith.cmpi slt, %9, %12 : vector<1x256xi32>
    %c0_i32_7 = arith.constant 0 : i32
    %14 = arith.cmpi slt, %7, %c0_i32_7 : i32
    %15 = vector.broadcast %14 : i1 to vector<1x256xi1>
    %16 = vector.broadcast %15 : vector<1x256xi1> to vector<1x256xi1>
    %17 = arith.xori %13, %16 : vector<1x256xi1>
    %18 = arith.andi %17, %11 : vector<1x256xi1>
    %19 = vector.broadcast %7 : i32 to vector<1x256xi32>
    %20 = arith.addi %9, %19 : vector<1x256xi32>
    %21 = arith.select %18, %20, %9 : vector<1x256xi1>, vector<1x256xi32>
    %c0_i32_8 = arith.constant 0 : i32
    %22 = vector.broadcast %c0_i32_8 : i32 to vector<1x256xi32>
    %23 = arith.cmpi ne, %21, %22 : vector<1x256xi32>
    %c15_i32 = arith.constant 15 : i32
    %24 = vector.broadcast %c15_i32 : i32 to vector<1x256xi32>
    %25 = arith.cmpi ne, %21, %24 : vector<1x256xi32>
    %c0_9 = arith.constant 0 : index
    %c111 = arith.constant 111 : index
    %26 = vector.load %arg5[%c0_9, %c111] : memref<8x512xf32, #tpu.memory_space<vmem>>, vector<8x256xf32>
    %cst_10 = arith.constant 0.000000e+00 : f32
    %27 = vector.shape_cast %23 : vector<1x256xi1> to vector<1x256xi1>
    %28 = vector.broadcast %27 : vector<1x256xi1> to vector<8x256xi1>
    %29 = vector.broadcast %cst_10 : f32 to vector<8x256xf32>
    %30 = arith.select %28, %26, %29 : vector<8x256xi1>, vector<8x256xf32>
    %c0_11 = arith.constant 0 : index
    %c0_12 = arith.constant 0 : index
    %31 = vector.load %arg6[%c0_11, %c0_12] : memref<72x256xf32, #tpu.memory_space<vmem>>, vector<8x256xf32>
    tpu.vector_store %arg6[%c0_11, %c0_12], %30 {strides = array<i32>} : memref<72x256xf32, #tpu.memory_space<vmem>>, vector<8x256xf32>,
    %c0_13 = arith.constant 0 : index
    %c112 = arith.constant 112 : index
    %32 = vector.load %arg5[%c0_13, %c112] : memref<8x512xf32, #tpu.memory_space<vmem>>, vector<8x256xf32>
    %c8 = arith.constant 8 : index
    %c0_14 = arith.constant 0 : index
    %33 = vector.load %arg6[%c8, %c0_14] : memref<72x256xf32, #tpu.memory_space<vmem>>, vector<8x256xf32>
    tpu.vector_store %arg6[%c8, %c0_14], %32 {strides = array<i32>} : memref<72x256xf32, #tpu.memory_space<vmem>>, vector<8x256xf32>,
    %c0_15 = arith.constant 0 : index
    %c113 = arith.constant 113 : index
    %34 = vector.load %arg5[%c0_15, %c113] : memref<8x512xf32, #tpu.memory_space<vmem>>, vector<8x256xf32>
    %cst_16 = arith.constant 0.000000e+00 : f32
    %35 = vector.shape_cast %25 : vector<1x256xi1> to vector<1x256xi1>
    %36 = vector.broadcast %35 : vector<1x256xi1> to vector<8x256xi1>
    %37 = vector.broadcast %cst_16 : f32 to vector<8x256xf32>
    %38 = arith.select %36, %34, %37 : vector<8x256xi1>, vector<8x256xf32>
    %c16 = arith.constant 16 : index
    %c0_17 = arith.constant 0 : index
    %39 = vector.load %arg6[%c16, %c0_17] : memref<72x256xf32, #tpu.memory_space<vmem>>, vector<8x256xf32>
    tpu.vector_store %arg6[%c16, %c0_17], %38 {strides = array<i32>} : memref<72x256xf32, #tpu.memory_space<vmem>>, vector<8x256xf32>,
    %c0_18 = arith.constant 0 : index
    %c127 = arith.constant 127 : index
    %40 = vector.load %arg5[%c0_18, %c127] : memref<8x512xf32, #tpu.memory_space<vmem>>, vector<8x256xf32>
    %cst_19 = arith.constant 0.000000e+00 : f32
    %41 = vector.shape_cast %23 : vector<1x256xi1> to vector<1x256xi1>
    %42 = vector.broadcast %41 : vector<1x256xi1> to vector<8x256xi1>
    %43 = vector.broadcast %cst_19 : f32 to vector<8x256xf32>
    %44 = arith.select %42, %40, %43 : vector<8x256xi1>, vector<8x256xf32>
    %c24 = arith.constant 24 : index
    %c0_20 = arith.constant 0 : index
    %45 = vector.load %arg6[%c24, %c0_20] : memref<72x256xf32, #tpu.memory_space<vmem>>, vector<8x256xf32>
    tpu.vector_store %arg6[%c24, %c0_20], %44 {strides = array<i32>} : memref<72x256xf32, #tpu.memory_space<vmem>>, vector<8x256xf32>,
    %c0_21 = arith.constant 0 : index
    %c128_22 = arith.constant 128 : index
    %46 = vector.load %arg5[%c0_21, %c128_22] : memref<8x512xf32, #tpu.memory_space<vmem>>, vector<8x256xf32>
    %c32 = arith.constant 32 : index
    %c0_23 = arith.constant 0 : index
    %47 = vector.load %arg6[%c32, %c0_23] : memref<72x256xf32, #tpu.memory_space<vmem>>, vector<8x256xf32>
    tpu.vector_store %arg6[%c32, %c0_23], %46 {strides = array<i32>} : memref<72x256xf32, #tpu.memory_space<vmem>>, vector<8x256xf32>,
    %c0_24 = arith.constant 0 : index
    %c129 = arith.constant 129 : index
    %48 = vector.load %arg5[%c0_24, %c129] : memref<8x512xf32, #tpu.memory_space<vmem>>, vector<8x256xf32>
    %cst_25 = arith.constant 0.000000e+00 : f32
    %49 = vector.shape_cast %25 : vector<1x256xi1> to vector<1x256xi1>
    %50 = vector.broadcast %49 : vector<1x256xi1> to vector<8x256xi1>
    %51 = vector.broadcast %cst_25 : f32 to vector<8x256xf32>
    %52 = arith.select %50, %48, %51 : vector<8x256xi1>, vector<8x256xf32>
    %c40 = arith.constant 40 : index
    %c0_26 = arith.constant 0 : index
    %53 = vector.load %arg6[%c40, %c0_26] : memref<72x256xf32, #tpu.memory_space<vmem>>, vector<8x256xf32>
    tpu.vector_store %arg6[%c40, %c0_26], %52 {strides = array<i32>} : memref<72x256xf32, #tpu.memory_space<vmem>>, vector<8x256xf32>,
    %c0_27 = arith.constant 0 : index
    %c143 = arith.constant 143 : index
    %54 = vector.load %arg5[%c0_27, %c143] : memref<8x512xf32, #tpu.memory_space<vmem>>, vector<8x256xf32>
    %cst_28 = arith.constant 0.000000e+00 : f32
    %55 = vector.shape_cast %23 : vector<1x256xi1> to vector<1x256xi1>
    %56 = vector.broadcast %55 : vector<1x256xi1> to vector<8x256xi1>
    %57 = vector.broadcast %cst_28 : f32 to vector<8x256xf32>
    %58 = arith.select %56, %54, %57 : vector<8x256xi1>, vector<8x256xf32>
    %c48 = arith.constant 48 : index
    %c0_29 = arith.constant 0 : index
    %59 = vector.load %arg6[%c48, %c0_29] : memref<72x256xf32, #tpu.memory_space<vmem>>, vector<8x256xf32>
    tpu.vector_store %arg6[%c48, %c0_29], %58 {strides = array<i32>} : memref<72x256xf32, #tpu.memory_space<vmem>>, vector<8x256xf32>,
    %c0_30 = arith.constant 0 : index
    %c144 = arith.constant 144 : index
    %60 = vector.load %arg5[%c0_30, %c144] : memref<8x512xf32, #tpu.memory_space<vmem>>, vector<8x256xf32>
    %c56 = arith.constant 56 : index
    %c0_31 = arith.constant 0 : index
    %61 = vector.load %arg6[%c56, %c0_31] : memref<72x256xf32, #tpu.memory_space<vmem>>, vector<8x256xf32>
    tpu.vector_store %arg6[%c56, %c0_31], %60 {strides = array<i32>} : memref<72x256xf32, #tpu.memory_space<vmem>>, vector<8x256xf32>,
    %c0_32 = arith.constant 0 : index
    %c145 = arith.constant 145 : index
    %62 = vector.load %arg5[%c0_32, %c145] : memref<8x512xf32, #tpu.memory_space<vmem>>, vector<8x256xf32>
    %cst_33 = arith.constant 0.000000e+00 : f32
    %63 = vector.shape_cast %25 : vector<1x256xi1> to vector<1x256xi1>
    %64 = vector.broadcast %63 : vector<1x256xi1> to vector<8x256xi1>
    %65 = vector.broadcast %cst_33 : f32 to vector<8x256xf32>
    %66 = arith.select %64, %62, %65 : vector<8x256xi1>, vector<8x256xf32>
    %c64 = arith.constant 64 : index
    %c0_34 = arith.constant 0 : index
    %67 = vector.load %arg6[%c64, %c0_34] : memref<72x256xf32, #tpu.memory_space<vmem>>, vector<8x256xf32>
    tpu.vector_store %arg6[%c64, %c0_34], %66 {strides = array<i32>} : memref<72x256xf32, #tpu.memory_space<vmem>>, vector<8x256xf32>,
    %c0_35 = arith.constant 0 : index
    %c0_36 = arith.constant 0 : index
    %68 = vector.load %arg2[%c0_35, %c0_36] : memref<32x72xf32, #tpu.memory_space<vmem>>, vector<32x72xf32>
    %c0_37 = arith.constant 0 : index
    %c0_38 = arith.constant 0 : index
    %69 = vector.load %arg6[%c0_37, %c0_38] : memref<72x256xf32, #tpu.memory_space<vmem>>, vector<72x256xf32>
    %cst_39 = arith.constant dense<0.000000e+00> : vector<32x256xf32>
    %70 = tpu.matmul %68, %69, %cst_39 {dimension_numbers = #tpu.dot_dimension_numbers<[1], [0], [0], [1], [0, 0, 1, 1], [], []>} : vector<32x72xf32>, vector<72x256xf32>, vector<32x256xf32> -> vector<32x256xf32>
    %c0_40 = arith.constant 0 : index
    %c0_41 = arith.constant 0 : index
    %71 = vector.load %arg3[%c0_40, %c0_41] : memref<32x1xf32, #tpu.memory_space<vmem>>, vector<32x1xf32>
    %72 = vector.broadcast %71 : vector<32x1xf32> to vector<32x256xf32>
    %73 = arith.addf %70, %72 : vector<32x256xf32>
    %c0_42 = arith.constant 0 : index
    %c0_43 = arith.constant 0 : index
    %c0_44 = arith.constant 0 : index
    %74 = vector.load %arg4[%c0_42, %c0_43, %c0_44] : memref<1x32x256xf32, #tpu.memory_space<vmem>>, vector<1x32x256xf32>
    %75 = vector.shape_cast %74 : vector<1x32x256xf32> to vector<32x256xf32>
    %76 = vector.shape_cast %73 : vector<32x256xf32> to vector<1x32x256xf32>
    tpu.vector_store %arg4[%c0_42, %c0_43, %c0_44], %76 {strides = array<i32>} : memref<1x32x256xf32, #tpu.memory_space<vmem>>, vector<1x32x256xf32>,
    return
  }
  func.func @transform_0(%arg0: i32) -> (i32, i32, i32) {
    %c0_i32 = arith.constant 0 : i32
    %c0_i32_0 = arith.constant 0 : i32
    %c0_i32_1 = arith.constant 0 : i32
    return %arg0, %c0_i32, %c0_i32_0 : i32, i32, i32
  }
  func.func @transform_1(%arg0: i32) -> (i32, i32) {
    %c0_i32 = arith.constant 0 : i32
    %c0_i32_0 = arith.constant 0 : i32
    %c0_i32_1 = arith.constant 0 : i32
    return %c0_i32, %c0_i32_0 : i32, i32
  }
  func.func @transform_2(%arg0: i32) -> (i32, i32) {
    %c0_i32 = arith.constant 0 : i32
    %c0_i32_0 = arith.constant 0 : i32
    %c0_i32_1 = arith.constant 0 : i32
    return %c0_i32, %c0_i32_0 : i32, i32
  }
  func.func @transform_3(%arg0: i32) -> (i32, i32, i32) {
    %c0_i32 = arith.constant 0 : i32
    %c0_i32_0 = arith.constant 0 : i32
    %c0_i32_1 = arith.constant 0 : i32
    return %arg0, %c0_i32, %c0_i32_0 : i32, i32, i32
  }
}

</mosaic_0001>

<bundles_post_ra>
// kernel: tpu_custom_call.1
= control target key start
LH: loop header
LB: loop body
LE: loop exit
PB: predicated region body
PF: predicated region fallthrough
CT: control target
= control target key end

     0   :  { %8 = vsyncpa [#allocation5], 0  ;;  %s1230_s0 = inlined_call_operand.hbm [shape: f32[2,4,256], index: 0, kind: input, shape index: {}]   ;;  %s1231_s1 = inlined_call_operand.vmem [shape: f32[32,72], index: 1, kind: input, shape index: {}]   ;;  %s1232_s2 = inlined_call_operand.vmem [shape: f32[32,1], index: 2, kind: input, shape index: {}]   ;;  %s1233_s3 = inlined_call_operand.hbm [shape: f32[2,32,256], index: 3, kind: output, shape index: {}]  }
   0x1   :  { %10 = vsyncpa [#allocation5 + $0x1], 0 }
   0x2   :  { %11 = vsyncpa [#allocation6], 0 }
   0x3   :  { %13 = vsyncpa [#allocation6 + $0x1], 0  ;;  %s941_s12 = smov 0   ;;  %s943_s13 = smov 0  }
   0x4   :  { %s945_s14 = smov 0   ;;  %s947_s15 = smov 0  }
   0x5 LB: > { %s962_s16 = sadd.s32 4294967295, %s905_s15   ;;  %s647_s17 = sadd.s32 4294967294, %s905_s15   ;;  %s905_s15 = sphi %s947_s15, %s1260_s15   ;;  %s901_s14 = sphi %s945_s14, %s1259_s14   ;;  %s897_s13 = sphi %s943_s13, %s1258_s13   ;;  %s893_s12 = sphi %s941_s12, %s1257_s12  }
   0x6   : > { %s966_s18 = sadd.s32 1, %s905_s15   ;;  %s26_s19 = sadd.s32 1, %s901_s14 }
   0x7   : > { %s23_s20 = ssub.s32 %s905_s15, %s966_s18  ;;  %p33_p0 = scmp.ne.s32.totalorder %s901_s14, %s897_s13 }
   0x8   : > { %p24_p1 = scmp.eq.s32.totalorder %s23_s20, 0  ;;  %p34_p2 = scmp.eq.s32.totalorder %s905_s15, 0 }
   0x9   : > { %p39_p3 = scmp.ne.s32.totalorder %s897_s13, %s893_s12  ;;  %p40_p4 = scmp.eq.s32.totalorder %s962_s16, 0 }
   0xa   : > { %s978_s21 = scalar_select %p24_p1, %s901_s14, %s26_s19  }
   0xb   : > { %p980_p5 = por %p34_p2, %p33_p0  ;;  %p984_p6 = por %p40_p4, %p39_p3 }
   0xc   : > { %p105_p7 = scmp.eq.s32.totalorder %s962_s16, 1  ;;  %p111_p8 = scmp.eq.s32.totalorder %s647_s17, 1 }
   0xd   : > { %p725_p10 = scmp.lt.s32.totalorder %s905_s15, 2  ;;  %s137_s26 = sand.u32 1, %s901_s14  }
   0xe   : > { %p991_p11 = por %p105_p7, %p33_p0  ;;  %p995_p12 = por %p111_p8, %p39_p3 }
   0xf   : > { %s665_s27 = sshll.u32 %s905_s15, 7  ;;  %s650_s28 = sshll.u32 %s137_s26, 3 }
  0x10   : > { %s1237_s24 = scalar_select %p991_p11, 1, 0 }
  0x11   : > { %s1238_s25 = scalar_select %p995_p12, 1, 0 }
  0x12   : > { %s1004_s4 = scalar_lea.hbm %s1230_s0, %s665_s27  ;;  %s141_s5 = scalar_lea.vmem [#allocation4], %s650_s28 }
  0x13   : > { %s149_s6 = sshll.u32 %s141_s5, 4  ;;  %p1008_p13 = pnand %p725_p10, %p980_p5  ;;  %s1012_s6 = int_to_ptr.vmem [resolvable:$true] %s149_s6 }
  0x14   : > { %s138_s8 = scalar_lea.sflag [#allocation5], %s137_s26  ;;  %s809_s9 = scalar_lea.hbm %s1004_s4, 128 }
  0x15   : > { %p810_p2 = scmp.ne.s32.totalorder %s1004_s4, %s809_s9  ;;  %p811_p3 = pneg %p1008_p13 }
  0x16   : > { %s814_s17 = scalar_lea.hbm %s1230_s0, 256  ;;  %p815_p5 = scmp.lt.u32.totalorder %s1004_s4, %s1230_s0 }
  0x17   : > { %p812_p4 = pnand %p811_p3, %p810_p2  ;;  %p816_p8 = scmp.lt.u32.totalorder %s814_s17, %s809_s9 }
  0x18   : > { %p818_p9 = scmp.lt.u32.totalorder %s809_s9, %s1004_s4 }
  0x19   : > { %p813_p7 = pneg %p812_p4  ;;  %p817_p10 = por %p816_p8, %p815_p5 }
  0x1b   : > { %p819_p0 = por %p818_p9, %p817_p10 }
  0x1d   : > { %p820_p1 = pnand %p819_p0, %p813_p7 }
  0x1f   : > { %823 = shalt.err (!%p820_p1)
}
  0x20   : > { %s824_s22 = scalar_lea.vmem %s1012_s6, 128  ;;  %s907_s26 = smov [#allocation4]  }
  0x21   : > { %p825_p2 = scmp.ne.s32.totalorder %s1012_s6, %s824_s22  ;;  %s829_s27 = sshll.u32 %s907_s26, 4  ;;  %s830_s27 = int_to_ptr.vmem [resolvable:$false] %s829_s27 }
  0x22   : > { %s831_s28 = scalar_lea.vmem %s830_s27, 256  ;;  %p832_p11 = scmp.lt.s32.totalorder %s1012_s6, %s830_s27 }
  0x23   : > { %p827_p4 = pnand %p825_p2, %p811_p3  ;;  %p833_p5 = scmp.lt.s32.totalorder %s831_s28, %s824_s22 }
  0x25   : > { %p828_p12 = pneg %p827_p4  ;;  %p834_p8 = por %p833_p5, %p832_p11 }
  0x27   : > { %p835_p9 = pnand %p834_p8, %p828_p12 }
  0x29   : > { %838 = shalt.err (!%p835_p9)
}
  0x2a   : > { %720 = dma.hbm_to_vmem [thread:$0]  (!%p1008_p13), %s1004_s4, 128, %s1012_s6, %s138_s8  }
  0x2b   : > { %p1240_p0 = scmp.lt.s32.totalorder %s905_s15, 3  ;;  %p1241_p1 = scmp.ge.s32.totalorder %s905_s15, 1 }
  0x2d   : > { %p155_p3 = pnand %p1241_p1, %p1240_p0 }
  0x2e   : > { %s1046_s29 = sand.u32 (!%p155_p3), 1, %s897_s13  }
  0x2f   : > { %158 = sbr.rel (%p155_p3) target bundleno = 447 (0x1bf), region = 32  ;;  %s654_s30 = sshll.u32 (!%p155_p3), %s1046_s29, 3 }
  0x30   : > { %s161_s5 = scalar_lea.sflag (!%p155_p3), [#allocation5], %s1046_s29  ;;  %s164_s9 = scalar_lea.vmem (!%p155_p3), [#allocation4], %s654_s30 }
  0x36   : > { %884 = dma.done.wait (%p984_p6), %s161_s5, 128  }
  0x37   : > { %886 = vsyncadd (%p984_p6), %s161_s5, 4294967168  ;;  %v908_v0 = vmov 0.0   ;;  %s909_s4 = smov 17   ;;  %s910_s6 = smov 15   ;;  %v191_v1 = vld [vmem:[%s164_s9] sm:$0xff]  ;;  %v917_v8 = vmov 0   ;;  %v197_v14 = vlaneseq }
  0x38   : > { %238 = vrot.lane.b32.xlu1 %v908_v0, %s909_s4  ;;  %188 = vst [vmem:[#allocation2 + $0x8] sm:$0xff] %v908_v0  ;;  %189 = vst [vmem:[#allocation2 + $0x10] sm:$0xff] %v908_v0  ;;  %282 = vrot.lane.b32.xlu0 %v908_v0, %s910_s6  ;;  %s911_s7 = smov 16   ;;  %v193_v2 = vcombine.high %v191_v1, %v191_v1  ;;  %s912_s23 = smov 1   ;;  %v426_v7 = vld [vmem:[%s1232_s2] sm:$0xff]  ;;  %v428_v9 = vld [vmem:[%s1232_s2 + $0x10] sm:$0xff] }
  0x39   : > { %527 = vmatprep.mubr.f32.mxu0 %v908_v0  ;;  %539 = vmatprep.mubr.f32.mxu1 %v908_v0  ;;  %195 = vst [vmem:[#allocation2 + $0x8] sm:$0xf] %v191_v1  ;;  %s913_s8 = smov 127   ;;  %s914_s10 = smov 112   ;;  %v429_v10 = vld [vmem:[%s1232_s2 + $0x18] sm:$0xff]  ;;  %v427_v11 = vld [vmem:[%s1232_s2 + $0x8] sm:$0xff] }
  0x3a   : > { %196 = vst [vmem:[#allocation2 + $0x10] sm:$0xf] %v193_v2  ;;  %s915_s11 = smov 113   ;;  %s916_s17 = smov 111   ;;  %806 = vset.pattern.permute.xlu1 %v917_v8  ;;  %807 = vset.pattern.permute.xlu0 %v917_v8  ;;  %v198_v15 = vand.u32 127, %v197_v14  ;;  %vm244_vm1 = vcmask 138240  }
  0x3b   : > { %vm265_vm2 = vcmask 130048   ;;  %vm309_vm4 = vcmask 7168   ;;  %vm918_vm5 = vmmov 1   ;;  %vm288_vm7 = vcmask 121856   ;;  %v404_v14 = vld [vmem:[%s1231_s1] sm:$0xff]  ;;  %s655_s19 = sshll.u32 %s1046_s29, 6 }
  0x3c   : > { %259 = vrot.lane.b32.xlu1 %v908_v0, %s911_s7  ;;  %v199_v18 = vadd.s32 128, %v198_v15  ;;  %v204_v22 = vand.u32 15, %v198_v15  ;;  %vm334_vm12 = vcmask 1039360   ;;  %vm376_vm14 = vcmask 916480   ;;  %v406_v15 = vld [vmem:[%s1231_s1 + $0x10] sm:$0xff]  ;;  %s186_s20 = scalar_lea.vmem [#allocation7], %s655_s19 }
  0x3d   : > { %s574_s22 = sshll.u32 %s186_s20, 4  ;;  %s666_s26 = sshll.u32 %s962_s16, 10  ;;  %s1180_s22 = int_to_ptr.vmem [resolvable:$true] %s574_s22 }
  0x3e   : > { %v211_v21 = vand.u32 15, %v199_v18  ;;  %vm1094_vm3 = vcmp.ne.s32.totalorder %v204_v22, 0  ;;  %vm1117_vm10 = vcmp.ne.s32.totalorder %v204_v22, 15  ;;  %v407_v18 = vld [vmem:[%s1231_s1 + $0x18] sm:$0xff]  ;;  %s1185_s16 = scalar_lea.hbm %s1233_s3, %s666_s26  ;;  %s561_s30 = scalar_lea.sflag [#allocation6], %s1046_s29 }
  0x3f   : > { %vm1108_vm8 = vmpackc.low %vm918_vm5, %vm1094_vm3  ;;  %s839_s5 = scalar_lea.vmem %s1180_s22, 1024  ;;  %p1254_p11 = scmp.ne.s32.totalorder %s1237_s24, 0 }
  0x40   : > { %303 = vrot.lane.b32.xlu1 %v908_v0, %s912_s23  ;;  %v1063_v3 = vld [vmem:[#allocation2 + $0x8] sm:$0xff]  ;;  %vm1090_vm0 = vcmp.ne.s32.totalorder %v211_v21, 0  ;;  %vm1112_vm9 = vcmp.ne.s32.totalorder %v211_v21, 15  ;;  %vm689_vm13 = vmpackc.low %vm1094_vm3, %vm1117_vm10  ;;  %vm450_vm3 = vcmask 588800   ;;  %p840_p6 = scmp.ne.s32.totalorder %s1180_s22, %s839_s5  ;;  %s919_s9 = smov [#allocation7]  }
  0x41   : > { %v1065_v4 = vld [vmem:[#allocation2 + $0x10] sm:$0xff]  ;;  %vm1101_vm6 = vmpackc.low %vm918_vm5, %vm1090_vm0 }
  0x42   : > { %v771_v5 = vpack.i.bf16 %v1065_v4, %v1063_v3  ;;  %v791_v6 = vpack.i.bf16 %v908_v0, %v1065_v4  ;;  %vm686_vm11 = vmpackc.low %vm1090_vm0, %vm1112_vm9  ;;  %p841_p12 = pnand %p840_p6, %p1254_p11 }
  0x43   : > { %vm692_vm15 = vmpackc.low %vm1112_vm9, %vm918_vm5 }
  0x44   : > { %772 = vrot.lane.b32.xlu0 %v771_v5, %s909_s4  ;;  %787 = vrot.lane.b32.xlu1 %v771_v5, %s912_s23  ;;  %vm695_vm0 = vmpackc.low %vm1117_vm10, %vm918_vm5  ;;  %p842_p13 = pneg %p841_p12  ;;  %s843_s4 = sshll.u32 %s919_s9, 4  ;;  %s844_s4 = int_to_ptr.vmem [resolvable:$false] %s843_s4 }
  0x45   : > { %p846_p7 = scmp.lt.s32.totalorder %s1180_s22, %s844_s4 }
  0x48   : > { %777 = vrot.lane.b32.xlu0 %v771_v5, %s911_s7  ;;  %328 = vrot.lane.b32.xlu1 %v1063_v3, %s913_s8 }
  0x4c   : > { %782 = vrot.lane.b32.xlu0 %v771_v5, %s910_s6  ;;  %802 = vrot.lane.b32.xlu1 %v791_v6, %s914_s10  ;;  %s845_s6 = scalar_lea.vmem %s844_s4, 2048 }
  0x4d   : > { %p847_p10 = scmp.lt.s32.totalorder %s845_s6, %s839_s5 }
  0x4f   : > { %p848_p2 = por %p847_p10, %p846_p7 }
  0x50   : > { %792 = vrot.lane.b32.xlu0 %v791_v6, %s913_s8  ;;  %370 = vrot.lane.b32.xlu1 %v1063_v3, %s914_s10 }
  0x51   : > { %p849_p4 = pnand %p848_p2, %p842_p13 }
  0x54   : > { %797 = vrot.lane.b32.xlu0 %v791_v6, %s915_s11  ;;  %393 = vrot.lane.b32.xlu1 %v908_v0, %s916_s17 }
  0x58   : > { %349 = vrot.lane.b32.xlu0 %v1063_v3, %s915_s11  ;;  %432 = vperm.xlu1 %806, %v426_v7  }
  0x5c   : > { %391 = vrot.lane.b32.xlu0 %v1065_v4, %s916_s17  ;;  %442 = vperm.xlu1 %806, %v428_v9  }
  0x60   : > { %389 = vrot.lane.b32.xlu0 %v1063_v3, %s916_s17  ;;  %447 = vperm.xlu1 %806, %v429_v10  }
  0x64   : > { %437 = vperm.xlu0 %807, %v427_v11  }
  0xaa   : > { %v239_v12 = vpop.permute.xlu1 %238  ;;  %v283_v16 = vpop.permute.xlu0 %282 }
  0xae   : > { %v260_v13 = vpop.permute.xlu1 %259 }
  0xb2   : > { %v304_v17 = vpop.permute.xlu1 %303 }
  0xb6   : > { %v773_v19 = vpop.permute.xlu0 %772  ;;  %v788_v20 = vpop.permute.xlu1 %787 }
  0xb7   : > { %v775_v23 = vunpack.i.h.bf16 %v773_v19  ;;  %v774_v24 = vunpack.i.l.bf16 %v773_v19  ;;  %v790_v30 = vunpack.i.h.bf16 %v788_v20  ;;  %v789_v32 = vunpack.i.l.bf16 %v788_v20 }
  0xb9   : > { %v246_v33 = vsel %vm244_vm1, %v774_v24, %v775_v23  ;;  %v245_v36 = vsel %vm244_vm1, %v239_v12, %v774_v24  ;;  %v311_v43 = vsel %vm309_vm4, %v789_v32, %v790_v30  ;;  %v310_v48 = vsel %vm309_vm4, %v304_v17, %v789_v32  ;;  %v405_v17 = vld [vmem:[%s1231_s1 + $0x8] sm:$0xff] }
  0xba   : > { %v778_v25 = vpop.permute.xlu0 %777  ;;  %v329_v27 = vpop.permute.xlu1 %328  ;;  %vm355_vm1 = vcmask 924672  }
  0xbb   : > { %v780_v28 = vunpack.i.h.bf16 %v778_v25  ;;  %v779_v29 = vunpack.i.l.bf16 %v778_v25 }
  0xbd   : > { %v267_v34 = vsel %vm265_vm2, %v779_v29, %v780_v28  ;;  %v266_v37 = vsel %vm265_vm2, %v260_v13, %v779_v29  ;;  %vm395_vm2 = vcmask 908288  }
  0xbe   : > { %v783_v38 = vpop.permute.xlu0 %782  ;;  %v679_v39 = vpack.c.bf16 %v267_v34, %v246_v33  ;;  %v682_v40 = vpack.c.bf16 %v266_v37, %v245_v36  ;;  %v803_v47 = vpop.permute.xlu1 %802 }
  0xbf   : > { %v785_v44 = vunpack.i.h.bf16 %v783_v38  ;;  %v784_v45 = vunpack.i.l.bf16 %v783_v38  ;;  %v805_v56 = vunpack.i.h.bf16 %v803_v47  ;;  %v804_v57 = vunpack.i.l.bf16 %v803_v47 }
  0xc0   : > { %681 = vmatprep.subr.msk.bf16.mxu0 %vm1101_vm6, %v679_v39  ;;  %703 = vmatprep.subr.msk.bf16.mxu1 %vm1101_vm6, %v679_v39 }
  0xc1   : > { %v289_v49 = vsel %vm288_vm7, %v283_v16, %v784_v45  ;;  %v290_v50 = vsel %vm288_vm7, %v784_v45, %v785_v44  ;;  %684 = vmatpush1.bf16.msk.msra.mxu0 %vm1108_vm8, %v682_v40  ;;  %708 = vmatpush1.bf16.msk.msra.mxu1 %vm1108_vm8, %v682_v40  ;;  %v378_v5 = vsel %vm376_vm14, %v804_v57, %v805_v56 }
  0xc2   : > { %v685_v51 = vpack.c.bf16 %v311_v43, %v290_v50  ;;  %v688_v52 = vpack.c.bf16 %v310_v48, %v289_v49  ;;  %v793_v53 = vpop.permute.xlu0 %792  ;;  %v371_v63 = vpop.permute.xlu1 %370 }
  0xc3   : > { %v795_v54 = vunpack.i.h.bf16 %v793_v53  ;;  %v794_v55 = vunpack.i.l.bf16 %v793_v53 }
  0xc4   : > { %687 = vmatprep.subr.msk.bf16.mxu0 %vm686_vm11, %v685_v51  ;;  %704 = vmatprep.subr.msk.bf16.mxu1 %vm686_vm11, %v685_v51 }
  0xc5   : > { %v336_v58 = vsel %vm334_vm12, %v794_v55, %v795_v54  ;;  %v335_v59 = vsel %vm334_vm12, %v329_v27, %v794_v55  ;;  %690 = vmatpush1.bf16.msk.msra.mxu0 %vm689_vm13, %v688_v52  ;;  %709 = vmatpush1.bf16.msk.msra.mxu1 %vm689_vm13, %v688_v52 }
  0xc6   : > { %v691_v60 = vpack.c.bf16 %v336_v58, %v1065_v4  ;;  %v694_v61 = vpack.c.bf16 %v335_v59, %v1063_v3  ;;  %v798_v62 = vpop.permute.xlu0 %797  ;;  %v377_v4 = vsel %vm376_vm14, %v371_v63, %v804_v57  ;;  %v394_v10 = vpop.permute.xlu1 %393 }
  0xc7   : > { %v800_v1 = vunpack.i.h.bf16 %v798_v62  ;;  %v799_v2 = vunpack.i.l.bf16 %v798_v62 }
  0xc8   : > { %693 = vmatprep.subr.msk.bf16.mxu0 %vm692_vm15, %v691_v60  ;;  %705 = vmatprep.subr.msk.bf16.mxu1 %vm692_vm15, %v691_v60 }
  0xc9   : > { %696 = vmatpush1.bf16.msk.msra.mxu0 %vm695_vm0, %v694_v61  ;;  %710 = vmatpush1.bf16.msk.msra.mxu1 %vm695_vm0, %v694_v61  ;;  %v357_v6 = vsel %vm355_vm1, %v799_v2, %v800_v1 }
  0xca   : > { %v350_v7 = vpop.permute.xlu0 %349  ;;  %v697_v3 = vpack.c.bf16 %v378_v5, %v357_v6 }
  0xcb   : > { %v356_v8 = vsel %vm355_vm1, %v350_v7, %v799_v2 }
  0xcc   : > { %v700_v9 = vpack.c.bf16 %v377_v4, %v356_v8  ;;  %699 = vmatprep.subr.msk.bf16.mxu0 %vm1101_vm6, %v697_v3  ;;  %706 = vmatprep.subr.msk.bf16.mxu1 %vm1101_vm6, %v697_v3 }
  0xce   : > { %v392_v11 = vpop.permute.xlu0 %391  ;;  %702 = vmatpush1.bf16.msk.msra.mxu0 %vm1108_vm8, %v700_v9  ;;  %711 = vmatpush1.bf16.msk.msra.mxu1 %vm1108_vm8, %v700_v9 }
  0xcf   : > { %v397_v12 = vsel %vm395_vm2, %v392_v11, %v394_v10 }
  0xd0   : > { %677 = vmatprep.subr.msk.mxu0 %vm1112_vm9, %v397_v12  ;;  %707 = vmatprep.subr.msk.mxu1 %vm1112_vm9, %v397_v12 }
  0xd2   : > { %v390_v13 = vpop.permute.xlu0 %389 }
  0xd3   : > { %v396_v16 = vsel %vm395_vm2, %v390_v13, %v392_v11 }
  0xd4   : > { %678 = vmatpush1.msk.msra.mxu0 %vm1117_vm10, %v396_v16  ;;  %712 = vmatpush1.msk.msra.mxu1 %vm1117_vm10, %v396_v16 }
  0xd5   : > { %656 = vmatmul.mubr.msk.f32.vlgmr.msra.gmra.mrb[0].mxu0 %vm450_vm3, %v404_v14  ;;  %658 = vmatmul.mubr.msk.f32.vlgmr.msra.gmra.mrb[0].mxu1 %vm450_vm3, %v406_v15 }
  0xd6   : > { %533 = vmatprep.mubr.f32.mxu0 %v908_v0  ;;  %545 = vmatprep.mubr.f32.mxu1 %v908_v0 }
  0xd7   : > { %v433_v19 = vpop.permute.xlu1 %432 }
  0xd9   : > { %657 = vmatmul.mubr.msk.f32.gmra.mrb[2].mxu0 %vm450_vm3, %v405_v17  ;;  %659 = vmatmul.mubr.msk.f32.gmra.mrb[2].mxu1 %vm450_vm3, %v407_v18 }
  0xdb   : > { %v443_v20 = vpop.permute.xlu1 %442 }
  0xdf   : > { %v448_v29 = vpop.permute.xlu1 %447 }
  0xe3   : > { %v438_v28 = vpop.permute.xlu0 %437 }
 0x1a8   : > { %v529_v21 = vpop.f32.mrb[0].mxu0  ;;  %v541_v22 = vpop.f32.mrb[0].mxu1 }
 0x1a9   : > { %v530_v23 = vadd.f32 %v529_v21, %v433_v19  ;;  %v542_v24 = vadd.f32 %v541_v22, %v443_v20  ;;  %v531_v25 = vpop.f32.mrb[1].mxu0  ;;  %v543_v0 = vpop.f32.mrb[1].mxu1 }
 0x1aa   : > { %v532_v26 = vadd.f32 %v531_v25, %v433_v19  ;;  %v544_v27 = vadd.f32 %v543_v0, %v443_v20 }
 0x1ab   : > { %552 = vst [vmem:[%s186_s20] sm:$0xff] %v530_v23  ;;  %556 = vst [vmem:[%s186_s20 + $0x20] sm:$0xff] %v542_v24 }
 0x1ac   : > { %553 = vst [vmem:[%s186_s20 + $0x8] sm:$0xff] %v532_v26  ;;  %557 = vst [vmem:[%s186_s20 + $0x28] sm:$0xff] %v544_v27  ;;  %v535_v30 = vpop.f32.mrb[2].mxu0  ;;  %v547_v31 = vpop.f32.mrb[2].mxu1 }
 0x1ad   : > { %v536_v32 = vadd.f32 %v535_v30, %v438_v28  ;;  %v548_v33 = vadd.f32 %v547_v31, %v448_v29  ;;  %v537_v34 = vpop.f32.mrb[3].mxu0  ;;  %v549_v35 = vpop.f32.mrb[3].mxu1 }
 0x1ae   : > { %v538_v36 = vadd.f32 %v537_v34, %v438_v28  ;;  %v550_v37 = vadd.f32 %v549_v35, %v448_v29 }
 0x1af   : > { %554 = vst [vmem:[%s186_s20 + $0x10] sm:$0xff] %v536_v32  ;;  %558 = vst [vmem:[%s186_s20 + $0x30] sm:$0xff] %v548_v33 }
 0x1b0   : > { %555 = vst [vmem:[%s186_s20 + $0x18] sm:$0xff] %v538_v36  ;;  %559 = vst [vmem:[%s186_s20 + $0x38] sm:$0xff] %v550_v37 }
 0x1b1   : > { %852 = shalt.err (!%p849_p4)
}
 0x1b2   : > { %s853_s23 = scalar_lea.hbm %s1185_s16, 1024  ;;  %s857_s11 = scalar_lea.hbm %s1233_s3, 2048 }
 0x1b3   : > { %p854_p5 = scmp.ne.s32.totalorder %s1185_s16, %s853_s23  ;;  %p858_p0 = scmp.lt.u32.totalorder %s1185_s16, %s1233_s3 }
 0x1b4   : > { %p859_p1 = scmp.lt.u32.totalorder %s857_s11, %s853_s23  ;;  %p861_p6 = scmp.lt.u32.totalorder %s853_s23, %s1185_s16 }
 0x1b5   : > { %p855_p8 = pnand %p854_p5, %p1254_p11 }
 0x1b6   : > { %p860_p3 = por %p859_p1, %p858_p0 }
 0x1b7   : > { %p856_p9 = pneg %p855_p8 }
 0x1b8   : > { %p862_p12 = por %p861_p6, %p860_p3 }
 0x1ba   : > { %p863_p13 = pnand %p862_p12, %p856_p9 }
 0x1bc   : > { %866 = shalt.err (!%p863_p13)
}
 0x1bd   : > { %s920_s20 = smov 256  }
 0x1be   : > { %715 = dma.vmem_to_hbm [thread:$0]  (%p1254_p11), %s1180_s22, 1024, %s1185_s16, %s561_s30, %s920_s20, %s920_s20, %s911_s7  }
 0x1bf PF: > { %s589_s26 = sand.u32 1, %s893_s12   ;;  %p1255_p7 = scmp.ne.s32.totalorder %s1238_s25, 0 }
 0x1c0   : > { %p1256_p10 = scmp.ge.s32.totalorder %s905_s15, 2  ;;  %s590_s27 = scalar_lea.sflag [#allocation6], %s589_s26 }
 0x1c2   : > { %p722_p2 = pnand %p1256_p10, %p1255_p7 }
 0x1c4   : > { %888 = dma.done.wait (!%p722_p2), %s590_s27, 1024  }
 0x1c5   : > { %890 = vsyncadd (!%p722_p2), %s590_s27, 4294966272  ;;  %p16_p4 = scmp.ge.s32.totalorder %s966_s18, 4   ;;  %s1257_s12 = smov %s897_s13 }
 0x1c6   : > { %s1258_s13 = smov %s901_s14  ;;  %s1259_s14 = smov %s978_s21 }
 0x1c7   : > { %s1260_s15 = smov %s966_s18  ;;  %18 = sbr.rel (!%p16_p4) target bundleno = 5 (0x5), region = 77 }
 0x1ce   :  { %595 = vsyncpa [#allocation5], 1 }
 0x1cf   :  { %597 = vsyncpa [#allocation5 + $0x1], 1 }
 0x1d0   :  { %598 = vsyncpa [#allocation6], 1 }
 0x1d1   :  { %600 = vsyncpa [#allocation6 + $0x1], 1 }

</bundles_post_ra>
